<compile_context>
chip_gen: v7x
topology: tpu7x:2x2x1
jax: 0.10.0
libtpu: 0.0.40
codegen_flags: <defaults>
</compile_context>

<pallas_src>
import jax
import jax.numpy as jnp
from jax import lax
from jax.experimental import pallas as pl
from jax.experimental.pallas import tpu as pltpu


# ----------------------------------------------------------------------------- 
# complex64 <-> interleaved float32 views
# -----------------------------------------------------------------------------
_COMPLEX_BITCAST = None


def _complex_bitcast_supported():
    """Probe (once) whether the backend allows complex64 <-> float32 bitcasts."""
    global _COMPLEX_BITCAST
    if _COMPLEX_BITCAST is None:
        try:
            p = lax.bitcast_convert_type(jnp.zeros((1,), jnp.complex64), jnp.float32)
            p = lax.bitcast_convert_type(p, jnp.complex64)
            jax.block_until_ready(p)
            _COMPLEX_BITCAST = p.shape == (1,)
        except Exception:  # XLA rejects complex bitcasts -> use the copy path.
            _COMPLEX_BITCAST = False
    return _COMPLEX_BITCAST


def _to_interleaved(x):
    """complex64 (...) -> float32 (..., 2) with [re, im] pairs."""
    if _complex_bitcast_supported():
        return lax.bitcast_convert_type(x, jnp.float32)          # zero-copy view
    # One fused pass (read 8B / write 8B per element).
    return jnp.stack([jnp.real(x), jnp.imag(x)], axis=-1)


def _from_interleaved(z):
    """float32 (..., 2) with [re, im] pairs -> complex64 (...)."""
    if _complex_bitcast_supported():
        return lax.bitcast_convert_type(z, jnp.complex64)         # zero-copy view
    return lax.complex(z[..., 0], z[..., 1])


# ----------------------------------------------------------------------------- 
# Kernel
# -----------------------------------------------------------------------------
def _modrelu_kernel(x_ref, b_ref, z_ref):
    """modReLU on one (tile_r, tile_l) block of interleaved [re, im] lanes.

    z = relu(|x| + b) / |x| * x      for |x| > 0
      = relu(b) + 0j                 for x == 0   (torch: angle(0) == 0)
    """
    x = x_ref[...]                                   # (tile_r, tile_l) f32
    b = b_ref[...]                                   # (tile_r, 1)      f32

    sq = x * x
    tl = x.shape[-1]

    # Pair-partner gather (partner of lane j is j ^ 1), robust to the rotation
    # direction of pltpu.roll: apply the same roll to a lane-index iota and pick
    # whichever rotation actually delivered the partner index to each lane.
    lane = lax.broadcasted_iota(jnp.int32, x.shape, 1)
    partner = lane ^ 1
    fwd = pltpu.roll(sq, 1, axis=1)
    bwd = pltpu.roll(sq, tl - 1, axis=1)
    fwd_lane = pltpu.roll(lane, 1, axis=1)
    partner_sq = jnp.where(fwd_lane == partner, fwd, bwd)

    s2 = sq + partner_sq                             # |x|^2 on both lanes of a pair
    safe = s2 > 0.0
    inv = lax.rsqrt(jnp.where(safe, s2, 1.0))        # 1/|x|   (single EUP op)
    scale = jnp.maximum(1.0 + b * inv, 0.0)          # relu(|x|+b)/|x| on safe branch

    relu_b = jnp.maximum(b, 0.0)                     # hoisted: once per bias column
    is_re = (lane & 1) == 0
    zero_case = jnp.where(is_re, relu_b, 0.0)        # x == 0 -> relu(b) + 0j

    z_ref[...] = jnp.where(safe, scale * x, zero_case)


# ----------------------------------------------------------------------------- 
# Wrapper
# -----------------------------------------------------------------------------
_TILE_R = 256           # sublane-axis tile (multiple of 8);  1 MiB/buffer with _TILE_L
_TILE_L = 1024          # lane-axis tile    (multiple of 128)
_PALLAS_MIN_ELEMS = 16384   # below this, a fused jnp expression beats pallas_call


def _round_up(v, m):
    return ((v + m - 1) // m) * m


def _modrelu_jnp(x, b):
    """Plain fused-XLA reference / small-input fallback (exact torch math)."""
    mag = jnp.abs(x)
    return (jnp.maximum(mag + b, 0.0) * jnp.exp(1j * jnp.angle(x))).astype(jnp.complex64)


def activation_forward(x, deadzone_b=None, activation_type="magic", eps=1e-8,
                       min_pallas_elems=_PALLAS_MIN_ELEMS):
    """Forward pass of the PyTorch `Activation` module.

    x: complex64 array of shape (N, C, H, W).  Returns complex64 (N, C, H, W).
    `eps` is kept for interface parity only (the torch forward never uses it);
    the |x| == 0 case is handled exactly inside the kernel.
    """
    if activation_type == "relu":
        # relu(|x|) * exp(i*angle(x)) == x for complex inputs.
        return jnp.asarray(x, jnp.complex64)
    if activation_type != "modrelu":
        raise ValueError("Invalid activation type specified!!!!")

    x = jnp.asarray(x, jnp.complex64)
    N, C, H, W = x.shape
    b = jnp.asarray(deadzone_b, jnp.float32).reshape(1, C, 1, 1)

    # Small-input fallback: pallas_call fixed overhead dominates and a single
    # fused XLA elementwise pass is also the minimum-HBM-traffic implementation.
    if N * C * H * W < min_pallas_elems:
        return _modrelu_jnp(x, b)

    R, HW = N * C, H * W
    L = 2 * HW                                        # interleaved lane length

    xf = _to_interleaved(x).reshape(R, L)             # (R, L) lanes = [re, im, ...]
    b_rows = jnp.broadcast_to(b.reshape(1, C), (N, C)).reshape(R, 1)

    # Keep the lane axis a multiple of 128 so output stores stay unmasked.
    L_pad = _round_up(L, 128)
    if L_pad != L:
        # TODO(synk): this pad (and the slice back) costs one extra HBM pass; it
        # only triggers when 2*H*W is not 128-aligned (e.g. 14x14 feature maps).
        xf = jnp.pad(xf, ((0, 0), (0, L_pad - L)))

    tile_r = R if R <= _TILE_R else _TILE_R
    tile_l = L_pad if L_pad <= _TILE_L else _TILE_L

    # v7x has 2 TensorCores sharing HBM: make sure a "parallel" axis has >= 2 steps.
    if pl.cdiv(R, tile_r) * pl.cdiv(L_pad, tile_l) < 2:
        if R >= 16:
            tile_r = _round_up((R + 1) // 2, 8)
        elif L_pad >= 256:
            tile_l = _round_up((L_pad + 1) // 2, 128)

    grid = (pl.cdiv(R, tile_r), pl.cdiv(L_pad, tile_l))   # lane axis innermost

    plane_spec = pl.BlockSpec((tile_r, tile_l), lambda i, j: (i, j))
    # Bias block index is constant across the inner (lane) loop -> DMA elided.
    bias_spec = pl.BlockSpec((tile_r, 1), lambda i, j: (i, 0))

    zf = pl.pallas_call(
        _modrelu_kernel,
        grid=grid,
        in_specs=[plane_spec, bias_spec],
        out_specs=plane_spec,
        out_shape=jax.ShapeDtypeStruct((R, L_pad), jnp.float32),
        compiler_params=pltpu.CompilerParams(
            dimension_semantics=("parallel", "parallel"),
        ),
    )(xf, b_rows)

    if L_pad != L:
        zf = zf[:, :L]
    return _from_interleaved(zf.reshape(N, C, H, W, 2))


# ----------------------------------------------------------------------------- 
# Demo / self-test
# -----------------------------------------------------------------------------
if __name__ == "__main__":
    key = jax.random.PRNGKey(0)
    k1, k2, k3, k4 = jax.random.split(key, 4)

    def make_complex(kr, ki, shape):
        return lax.complex(jax.random.normal(kr, shape, jnp.float32),
                           jax.random.normal(ki, shape, jnp.float32))

    # 1) Module-default small shape, Pallas kernel forced on (min_pallas_elems=0).
    N, C, H, W = 2, 4, 16, 16
    x_small = make_complex(k1, k2, (N, C, H, W))
    x_small = x_small.at[0, 0, 0, 0].set(0.0 + 0.0j)   # exercise the x == 0 branch
    b_neg = jnp.full((1, C, 1, 1), -0.1, jnp.float32)  # nn.init.constant_(b, -0.1)
    b_pos = jnp.full((1, C, 1, 1), 0.2, jnp.float32)

    for b in (b_neg, b_pos):
        z = jax.block_until_ready(
            activation_forward(x_small, b, "modrelu", min_pallas_elems=0))
        ref = _modrelu_jnp(x_small, b)
        assert z.shape == x_small.shape and z.dtype == jnp.complex64
        assert jnp.allclose(z, ref, atol=1e-5, rtol=1e-5), "modrelu kernel mismatch"

    # 2) Larger shape, default policy (multi-step lane grid through the kernel).
    N2, C2, H2, W2 = 2, 4, 64, 64
    x_big = make_complex(k3, k4, (N2, C2, H2, W2))
    b2 = jnp.full((1, C2, 1, 1), -0.1, jnp.float32)
    z_big = jax.block_until_ready(activation_forward(x_big, b2, "modrelu"))
    assert jnp.allclose(z_big, _modrelu_jnp(x_big, b2), atol=1e-5, rtol=1e-5), \
        "modrelu kernel mismatch (large)"

    # 3) Small-input fallback path (plain fused XLA).
    z_small = jax.block_until_ready(activation_forward(x_small, b_neg, "modrelu"))
    assert jnp.allclose(z_small, _modrelu_jnp(x_small, b_neg), atol=1e-5, rtol=1e-5), \
        "fallback mismatch"

    # 4) relu path: identity on complex inputs.
    z_relu = jax.block_until_ready(
        activation_forward(x_small, activation_type="relu"))
    ref_relu = (jnp.abs(x_small) * jnp.exp(1j * jnp.angle(x_small))).astype(jnp.complex64)
    assert jnp.allclose(z_relu, ref_relu, atol=1e-5, rtol=1e-5), "relu mismatch"

    print("KERNEL_OK")
</pallas_src>

<mosaic_0001>
module attributes {stable_mosaic.version = 11 : i64} {
  func.func @_modrelu_kernel(%arg0: i32, %arg1: i32, %arg2: memref<8x256xf32, #tpu.memory_space<vmem>>, %arg3: memref<8x1xf32, #tpu.memory_space<vmem>>, %arg4: memref<8x256xf32, #tpu.memory_space<vmem>>) attributes {dimension_semantics = [#tpu.dimension_semantics<parallel>, #tpu.dimension_semantics<parallel>], iteration_bounds = array<i64: 1, 2>, scalar_prefetch = 0 : i64, scratch_operands = 0 : i64, tpu.core_type = #tpu.core_type<tc>, window_params = [{transform_indices = @transform_0, window_bounds = array<i64: 8, 256>}, {transform_indices = @transform_1, window_bounds = array<i64: 8, 1>}, {transform_indices = @transform_2, window_bounds = array<i64: 8, 256>}]} {
    %c0 = arith.constant 0 : index
    %c0_0 = arith.constant 0 : index
    %0 = vector.load %arg2[%c0, %c0_0] : memref<8x256xf32, #tpu.memory_space<vmem>>, vector<8x256xf32>
    %c0_1 = arith.constant 0 : index
    %c0_2 = arith.constant 0 : index
    %1 = vector.load %arg3[%c0_1, %c0_2] : memref<8x1xf32, #tpu.memory_space<vmem>>, vector<8x1xf32>
    %2 = arith.mulf %0, %0 : vector<8x256xf32>
    %3 = tpu.iota {dimensions = array<i32: 1>} : vector<8x256xi32>
    %c1_i32 = arith.constant 1 : i32
    %4 = vector.broadcast %c1_i32 : i32 to vector<8x256xi32>
    %5 = arith.xori %3, %4 : vector<8x256xi32>
    %c1_i32_3 = arith.constant 1 : i32
    %6 = tpu.dynamic_rotate %2 by %c1_i32_3 dim 1 : vector<8x256xf32>, i32 -> vector<8x256xf32>
    %c255_i32 = arith.constant 255 : i32
    %7 = tpu.dynamic_rotate %2 by %c255_i32 dim 1 : vector<8x256xf32>, i32 -> vector<8x256xf32>
    %c1_i32_4 = arith.constant 1 : i32
    %8 = tpu.dynamic_rotate %3 by %c1_i32_4 dim 1 : vector<8x256xi32>, i32 -> vector<8x256xi32>
    %9 = arith.cmpi eq, %8, %5 : vector<8x256xi32>
    %10 = arith.select %9, %6, %7 : vector<8x256xi1>, vector<8x256xf32>
    %11 = arith.addf %2, %10 : vector<8x256xf32>
    %cst = arith.constant 0.000000e+00 : f32
    %12 = vector.broadcast %cst : f32 to vector<8x256xf32>
    %13 = arith.cmpf ogt, %11, %12 : vector<8x256xf32>
    %cst_5 = arith.constant 1.000000e+00 : f32
    %14 = vector.broadcast %cst_5 : f32 to vector<8x256xf32>
    %15 = arith.select %13, %11, %14 : vector<8x256xi1>, vector<8x256xf32>
    %16 = math.rsqrt %15 : vector<8x256xf32>
    %17 = vector.broadcast %1 : vector<8x1xf32> to vector<8x256xf32>
    %18 = arith.mulf %17, %16 : vector<8x256xf32>
    %cst_6 = arith.constant 1.000000e+00 : f32
    %19 = vector.broadcast %cst_6 : f32 to vector<8x256xf32>
    %20 = arith.addf %19, %18 : vector<8x256xf32>
    %cst_7 = arith.constant 0.000000e+00 : f32
    %21 = vector.broadcast %cst_7 : f32 to vector<8x256xf32>
    %22 = arith.maximumf %20, %21 : vector<8x256xf32>
    %cst_8 = arith.constant 0.000000e+00 : f32
    %23 = vector.broadcast %cst_8 : f32 to vector<8x1xf32>
    %24 = arith.maximumf %1, %23 : vector<8x1xf32>
    %c1_i32_9 = arith.constant 1 : i32
    %25 = vector.broadcast %c1_i32_9 : i32 to vector<8x256xi32>
    %26 = arith.andi %3, %25 : vector<8x256xi32>
    %c0_i32 = arith.constant 0 : i32
    %27 = vector.broadcast %c0_i32 : i32 to vector<8x256xi32>
    %28 = arith.cmpi eq, %26, %27 : vector<8x256xi32>
    %cst_10 = arith.constant 0.000000e+00 : f32
    %29 = vector.shape_cast %24 : vector<8x1xf32> to vector<8x1xf32>
    %30 = vector.broadcast %29 : vector<8x1xf32> to vector<8x256xf32>
    %31 = vector.broadcast %cst_10 : f32 to vector<8x256xf32>
    %32 = arith.select %28, %30, %31 : vector<8x256xi1>, vector<8x256xf32>
    %33 = arith.mulf %22, %0 : vector<8x256xf32>
    %34 = arith.select %13, %33, %32 : vector<8x256xi1>, vector<8x256xf32>
    %c0_11 = arith.constant 0 : index
    %c0_12 = arith.constant 0 : index
    %35 = vector.load %arg4[%c0_11, %c0_12] : memref<8x256xf32, #tpu.memory_space<vmem>>, vector<8x256xf32>
    tpu.vector_store %arg4[%c0_11, %c0_12], %34 {strides = array<i32>} : memref<8x256xf32, #tpu.memory_space<vmem>>, vector<8x256xf32>,
    return
  }
  func.func @transform_0(%arg0: i32, %arg1: i32) -> (i32, i32) {
    %c0_i32 = arith.constant 0 : i32
    return %arg0, %arg1 : i32, i32
  }
  func.func @transform_1(%arg0: i32, %arg1: i32) -> (i32, i32) {
    %c0_i32 = arith.constant 0 : i32
    %c0_i32_0 = arith.constant 0 : i32
    return %arg0, %c0_i32 : i32, i32
  }
  func.func @transform_2(%arg0: i32, %arg1: i32) -> (i32, i32) {
    %c0_i32 = arith.constant 0 : i32
    return %arg0, %arg1 : i32, i32
  }
}

</mosaic_0001>

<bundles_post_ra>
// kernel: tpu_custom_call.1
= control target key start
LH: loop header
LB: loop body
LE: loop exit
PB: predicated region body
PF: predicated region fallthrough
CT: control target
= control target key end

     0   :  { %7 = vsyncpa [#allocation3], 0  ;;  %s796_s0 = inlined_call_operand.hbm [shape: f32[8,512], index: 0, kind: input, shape index: {}]   ;;  %s797_s1 = inlined_call_operand.vmem [shape: f32[8,1], index: 1, kind: input, shape index: {}]   ;;  %s798_s2 = inlined_call_operand.hbm [shape: f32[8,512], index: 2, kind: output, shape index: {}]  }
   0x1   :  { %9 = vsyncpa [#allocation3 + $0x1], 0 }
   0x2   :  { %10 = vsyncpa [#allocation4], 0 }
   0x3   :  { %12 = vsyncpa [#allocation4 + $0x1], 0  ;;  %s607_s9 = smov 0   ;;  %s609_s10 = smov 0  }
   0x4   :  { %s611_s11 = smov 0   ;;  %s613_s12 = smov 0  }
   0x5   :  { %s615_s13 = smov 0   ;;  %s617_s14 = smov 0  }
   0x6 LB: > { %s384_s15 = sadd.s32 4294967295, %s585_s14   ;;  %s385_s16 = sadd.s32 4294967294, %s585_s14   ;;  %s585_s14 = sphi %s617_s14, %s18_s14   ;;  %s581_s13 = sphi %s615_s13, %s816_s13   ;;  %s577_s12 = sphi %s613_s12, %s815_s12   ;;  %s573_s11 = sphi %s611_s11, %s814_s11   ;;  %s569_s10 = sphi %s609_s10, %s813_s10   ;;  %s565_s9 = sphi %s607_s9, %s812_s9  }
   0x7   : > { %s27_s17 = sadd.s32 1, %s581_s13  ;;  %s39_s18 = sadd.s32 1, %s573_s11 }
   0x8   : > { %p28_p0 = scmp.ge.s32.totalorder %s27_s17, 2  ;;  %p46_p1 = scmp.ne.s32.totalorder %s573_s11, %s569_s10 }
   0x9   : > { %p47_p2 = scmp.eq.s32.totalorder %s585_s14, 0  ;;  %p52_p3 = scmp.ne.s32.totalorder %s569_s10, %s565_s9 }
   0xa   : > { %s818_s17 = smov (%p28_p0, %s27_s17), 0  ;;  %p53_p5 = scmp.eq.s32.totalorder %s384_s15, 0 }
   0xb   : > { %p648_p4 = por %p47_p2, %p46_p1  ;;  %s35_s20 = ssub.s32 %s581_s13, %s818_s17 }
   0xc   : > { %p104_p6 = scmp.eq.s32.totalorder %s384_s15, 1  ;;  %p37_p7 = scmp.eq.s32.totalorder %s35_s20, 0 }
   0xd   : > { %p654_p8 = por %p53_p5, %p52_p3  ;;  %p110_p10 = scmp.eq.s32.totalorder %s385_s16, 1 }
   0xe   : > { %p658_p9 = por %p104_p6, %p46_p1  ;;  %p414_p13 = scmp.lt.s32.totalorder %s585_s14, 2 }
   0xf   : > { %s663_s23 = scalar_select %p37_p7, %s573_s11, %s39_s18  }
  0x10   : > { %s802_s22 = scalar_select %p658_p9, 1, 0 }
  0x11   : > { %p665_p11 = por %p110_p10, %p52_p3  ;;  %s137_s25 = sand.u32 1, %s573_s11  }
  0x12   : > { %s389_s26 = sshll.u32 %s137_s25, 4  ;;  %s400_s27 = sshll.u32 %s581_s13, 8 }
  0x13   : > { %s803_s24 = scalar_select %p665_p11, 1, 0 }
  0x14   : > { %s676_s30 = scalar_lea.hbm %s796_s0, %s400_s27  ;;  %s141_s3 = scalar_lea.vmem [#allocation2], %s389_s26 }
  0x15   : > { %s151_s4 = sshll.u32 %s141_s3, 4  ;;  %p682_p0 = pnand %p414_p13, %p648_p4  ;;  %s678_s4 = int_to_ptr.vmem [resolvable:$true] %s151_s4 }
  0x16   : > { %s138_s6 = scalar_lea.sflag [#allocation3], %s137_s25  ;;  %s473_s7 = scalar_lea.hbm %s676_s30, 256 }
  0x17   : > { %p474_p3 = scmp.ne.s32.totalorder %s676_s30, %s473_s7  ;;  %p475_p5 = pneg %p682_p0 }
  0x18   : > { %s478_s16 = scalar_lea.hbm %s796_s0, 512  ;;  %p479_p4 = scmp.lt.u32.totalorder %s676_s30, %s796_s0 }
  0x19   : > { %p476_p6 = pnand %p475_p5, %p474_p3  ;;  %p480_p10 = scmp.lt.u32.totalorder %s478_s16, %s473_s7 }
  0x1a   : > { %p482_p12 = scmp.lt.u32.totalorder %s473_s7, %s676_s30 }
  0x1b   : > { %p477_p7 = pneg %p476_p6  ;;  %p481_p13 = por %p480_p10, %p479_p4 }
  0x1d   : > { %p483_p1 = por %p482_p12, %p481_p13 }
  0x1f   : > { %p484_p2 = pnand %p483_p1, %p477_p7 }
  0x21   : > { %487 = shalt.err (!%p484_p2)
}
  0x22   : > { %s488_s20 = scalar_lea.vmem %s678_s4, 256  ;;  %s587_s25 = smov [#allocation2]  }
  0x23   : > { %p489_p3 = scmp.ne.s32.totalorder %s678_s4, %s488_s20  ;;  %s493_s26 = sshll.u32 %s587_s25, 4  ;;  %s494_s26 = int_to_ptr.vmem [resolvable:$false] %s493_s26 }
  0x24   : > { %s495_s27 = scalar_lea.vmem %s494_s26, 512  ;;  %p496_p9 = scmp.lt.s32.totalorder %s678_s4, %s494_s26 }
  0x25   : > { %p491_p6 = pnand %p489_p3, %p475_p5  ;;  %p497_p4 = scmp.lt.s32.totalorder %s495_s27, %s488_s20 }
  0x27   : > { %p492_p11 = pneg %p491_p6  ;;  %p498_p10 = por %p497_p4, %p496_p9 }
  0x29   : > { %p499_p12 = pnand %p498_p10, %p492_p11 }
  0x2b   : > { %502 = shalt.err (!%p499_p12)
}
  0x2c   : > { %409 = dma.hbm_to_vmem [thread:$0]  (!%p682_p0), %s676_s30, 256, %s678_s4, %s138_s6  }
  0x2d   : > { %p805_p1 = scmp.lt.s32.totalorder %s585_s14, 3  ;;  %p806_p2 = scmp.ge.s32.totalorder %s585_s14, 1 }
  0x2f   : > { %p157_p5 = pnand %p806_p2, %p805_p1 }
  0x30   : > { %s718_s28 = sand.u32 (!%p157_p5), 1, %s569_s10  }
  0x31   : > { %160 = sbr.rel (%p157_p5) target bundleno = 225 (0xe1), region = 28  ;;  %s393_s29 = sshll.u32 (!%p157_p5), %s718_s28, 4 }
  0x32   : > { %s163_s3 = scalar_lea.sflag (!%p157_p5), [#allocation3], %s718_s28  ;;  %s166_s5 = scalar_lea.vmem (!%p157_p5), [#allocation2], %s393_s29 }
  0x38   : > { %556 = dma.done.wait (%p654_p8), %s163_s3, 256  }
  0x39   : > { %558 = vsyncadd (%p654_p8), %s163_s3, 4294967040  ;;  %v202_v0 = vlaneseq  ;;  %v588_v1 = vmov 0   ;;  %s589_s30 = smov 1   ;;  %v197_v4 = vld [vmem:[%s166_s5] sm:$0xff]  ;;  %v198_v5 = vld [vmem:[%s166_s5 + $0x8] sm:$0xff]  ;;  %s590_s4 = smov 127  }
  0x3a   : > { %467 = vset.pattern.permute.xlu0 %v588_v1  ;;  %468 = vset.pattern.permute.xlu1 %v588_v1  ;;  %v200_v6 = vmul.f32 %v197_v4, %v197_v4  ;;  %v201_v7 = vmul.f32 %v198_v5, %v198_v5  ;;  %v199_v8 = vld [vmem:[%s797_s1] sm:$0xff]  ;;  %s401_s21 = sshll.u32 %s577_s12, 8  ;;  %s190_s8 = scalar_lea.vmem [#allocation5], %s393_s29 }
  0x3b   : > { %v203_v2 = vand.u32 127, %v202_v0  ;;  %v250_v9 = vmax.f32 %v199_v8, 0.0  ;;  %s285_s15 = sshll.u32 %s190_s8, 4  ;;  %s746_s19 = scalar_lea.hbm %s798_s2, %s401_s21  ;;  %s748_s15 = int_to_ptr.vmem [resolvable:$true] %s285_s15 }
  0x3c   : > { %207 = vrot.lane.b32.xlu1 %v200_v6, %s589_s30  ;;  %s269_s12 = scalar_lea.sflag [#allocation4], %s718_s28  ;;  %s503_s20 = scalar_lea.vmem %s748_s15, 256 }
  0x3d   : > { %221 = vrot.lane.b32.xlu0 %v203_v2, %s589_s30  ;;  %v204_v3 = vadd.s32 128, %v203_v2  ;;  %vm211_vm0 = vcmp.lt.s32.totalorder %v203_v2, 1  ;;  %v205_v16 = vxor.u32 1, %v203_v2  ;;  %vm218_vm2 = vcmp.lt.s32.totalorder %v203_v2, 127  ;;  %p504_p8 = scmp.ne.s32.totalorder %s748_s15, %s503_s20  ;;  %p809_p9 = scmp.ne.s32.totalorder %s802_s22, 0 }
  0x3e   : > { %v251_v32 = vand.u32 1, %v203_v2  ;;  %s591_s25 = smov [#allocation5]  }
  0x3f   : > { %v206_v11 = vxor.u32 1, %v204_v3  ;;  %v252_v34 = vand.u32 1, %v204_v3  ;;  %p505_p11 = pnand %p504_p8, %p809_p9  ;;  %s507_s26 = sshll.u32 %s591_s25, 4  ;;  %s508_s26 = int_to_ptr.vmem [resolvable:$false] %s507_s26 }
  0x40   : > { %209 = vrot.lane.b32.xlu1 %v201_v7, %s589_s30  ;;  %vm253_vm6 = vcmp.eq.s32.totalorder %v251_v32, 0  ;;  %s509_s27 = scalar_lea.vmem %s508_s26, 512  ;;  %p510_p7 = scmp.lt.s32.totalorder %s748_s15, %s508_s26 }
  0x41   : > { %223 = vrot.lane.b32.xlu0 %v204_v3, %s589_s30  ;;  %vm254_vm7 = vcmp.eq.s32.totalorder %v252_v34, 0  ;;  %p506_p0 = pneg %p505_p11  ;;  %p511_p13 = scmp.lt.s32.totalorder %s509_s27, %s503_s20 }
  0x43   : > { %p512_p3 = por %p511_p13, %p510_p7 }
  0x44   : > { %216 = vrot.lane.b32.xlu1 %v201_v7, %s590_s4 }
  0x45   : > { %214 = vrot.lane.b32.xlu0 %v200_v6, %s590_s4  ;;  %p513_p6 = pnand %p512_p3, %p506_p0 }
  0x48   : > { %257 = vperm.xlu1 %468, %v250_v9  }
  0x49   : > { %241 = vperm.xlu0 %467, %v199_v8  }
  0xae   : > { %v208_v15 = vpop.permute.xlu1 %207 }
  0xaf   : > { %v222_v10 = vpop.permute.xlu0 %221 }
  0xb2   : > { %v210_v17 = vpop.permute.xlu1 %209 }
  0xb3   : > { %v224_v12 = vpop.permute.xlu0 %223  ;;  %v212_v21 = vsel %vm211_vm0, %v208_v15, %v210_v17  ;;  %v213_v22 = vsel %vm211_vm0, %v210_v17, %v208_v15 }
  0xb4   : > { %v225_v13 = vsel %vm211_vm0, %v222_v10, %v224_v12  ;;  %v226_v18 = vsel %vm211_vm0, %v224_v12, %v222_v10 }
  0xb5   : > { %vm731_vm1 = vcmp.eq.s32.totalorder %v225_v13, %v206_v11  ;;  %vm227_vm3 = vcmp.eq.s32.totalorder %v226_v18, %v205_v16 }
  0xb6   : > { %v217_v20 = vpop.permute.xlu1 %216 }
  0xb7   : > { %v215_v19 = vpop.permute.xlu0 %214 }
  0xb8   : > { %v219_v23 = vsel %vm218_vm2, %v215_v19, %v217_v20  ;;  %v220_v24 = vsel %vm218_vm2, %v217_v20, %v215_v19 }
  0xb9   : > { %v229_v25 = vsel %vm227_vm3, %v213_v22, %v219_v23  ;;  %v230_v26 = vsel %vm731_vm1, %v212_v21, %v220_v24 }
  0xba   : > { %v231_v27 = vadd.f32 %v229_v25, %v200_v6  ;;  %v232_v28 = vadd.f32 %v230_v26, %v201_v7 }
  0xbc   : > { %vm233_vm4 = vcmp.gt.f32.partialorder %v231_v27, 0.0  ;;  %vm234_vm5 = vcmp.gt.f32.partialorder %v232_v28, 0.0 }
  0xbd   : > { %v235_v29 = vsel %vm233_vm4, %v231_v27, 1.0  ;;  %v236_v30 = vsel %vm234_vm5, %v232_v28, 1.0 }
  0xbe   : > { %469 = vrsqrt.f32 %v235_v29 }
  0xbf   : > { %471 = vrsqrt.f32 %v236_v30 }
  0xc7   : > { %v258_v39 = vpop.permute.xlu1 %257 }
  0xc8   : > { %v242_v31 = vpop.permute.xlu0 %241  ;;  %v470_v33 = vpop.eup %469  ;;  %v260_v43 = vsel %vm253_vm6, %v258_v39, 0.0  ;;  %v261_v45 = vsel %vm254_vm7, %v258_v39, 0.0 }
  0xc9   : > { %v472_v35 = vpop.eup %471  ;;  %v244_v36 = vmul.f32 %v470_v33, %v242_v31 }
  0xca   : > { %v245_v37 = vmul.f32 %v472_v35, %v242_v31 }
  0xcb   : > { %v246_v38 = vadd.f32 1.0, %v244_v36 }
  0xcc   : > { %v247_v40 = vadd.f32 1.0, %v245_v37 }
  0xcd   : > { %v248_v41 = vmax.f32 %v246_v38, 0.0 }
  0xce   : > { %v249_v42 = vmax.f32 %v247_v40, 0.0 }
  0xcf   : > { %v262_v44 = vmul.f32 %v248_v41, %v197_v4 }
  0xd0   : > { %v263_v46 = vmul.f32 %v249_v42, %v198_v5 }
  0xd1   : > { %v264_v47 = vsel %vm233_vm4, %v262_v44, %v260_v43 }
  0xd2   : > { %v265_v48 = vsel %vm234_vm5, %v263_v46, %v261_v45  ;;  %266 = vst [vmem:[%s190_s8] sm:$0xff] %v264_v47 }
  0xd3   : > { %267 = vst [vmem:[%s190_s8 + $0x8] sm:$0xff] %v265_v48 }
  0xd4   : > { %516 = shalt.err (!%p513_p6)
}
  0xd5   : > { %s517_s28 = scalar_lea.hbm %s746_s19, 256  ;;  %s521_s5 = scalar_lea.hbm %s798_s2, 512 }
  0xd6   : > { %p518_p4 = scmp.ne.s32.totalorder %s746_s19, %s517_s28  ;;  %p522_p1 = scmp.lt.u32.totalorder %s746_s19, %s798_s2 }
  0xd7   : > { %p523_p2 = scmp.lt.u32.totalorder %s521_s5, %s517_s28  ;;  %p525_p8 = scmp.lt.u32.totalorder %s517_s28, %s746_s19 }
  0xd8   : > { %p519_p10 = pnand %p518_p4, %p809_p9 }
  0xd9   : > { %p524_p5 = por %p523_p2, %p522_p1 }
  0xda   : > { %p520_p12 = pneg %p519_p10 }
  0xdb   : > { %p526_p11 = por %p525_p8, %p524_p5 }
  0xdd   : > { %p527_p0 = pnand %p526_p11, %p520_p12 }
  0xdf   : > { %530 = shalt.err (!%p527_p0)
}
  0xe0   : > { %404 = dma.vmem_to_hbm [thread:$0]  (%p809_p9), %s748_s15, 256, %s746_s19, %s269_s12  }
  0xe1 PF: > { %s297_s6 = sand.u32 1, %s565_s9   ;;  %p810_p7 = scmp.ne.s32.totalorder %s803_s24, 0 }
  0xe2   : > { %p811_p13 = scmp.ge.s32.totalorder %s585_s14, 2  ;;  %s298_s7 = scalar_lea.sflag [#allocation4], %s297_s6 }
  0xe4   : > { %p411_p3 = pnand %p811_p13, %p810_p7 }
  0xe6   : > { %560 = dma.done.wait (!%p411_p3), %s298_s7, 256  }
  0xe7   : > { %562 = vsyncadd (!%p411_p3), %s298_s7, 4294967040  ;;  %s18_s14 = sadd.s32 1, %s585_s14   ;;  %s812_s9 = smov %s569_s10 }
  0xe8   : > { %p15_p6 = scmp.ge.s32.totalorder %s18_s14, 4   ;;  %s813_s10 = smov %s573_s11 }
  0xe9   : > { %s814_s11 = smov %s663_s23  ;;  %s815_s12 = smov %s581_s13 }
  0xea   : > { %s816_s13 = smov %s818_s17  ;;  %17 = sbr.rel (!%p15_p6) target bundleno = 6 (0x6), region = 76 }
  0xf1   :  { %303 = vsyncpa [#allocation3], 1 }
  0xf2   :  { %305 = vsyncpa [#allocation3 + $0x1], 1 }
  0xf3   :  { %306 = vsyncpa [#allocation4], 1 }
  0xf4   :  { %308 = vsyncpa [#allocation4 + $0x1], 1 }

</bundles_post_ra>
